<compile_context>
chip_gen: v7x
topology: tpu7x:2x2x1
jax: 0.10.0
libtpu: 0.0.40
codegen_flags: <defaults>
</compile_context>

<pallas_src>
import jax
import jax.numpy as jnp
from jax.experimental import pallas as pl
from jax.experimental.pallas import tpu as pltpu


def _round_up(x, m):
    return ((x + m - 1) // m) * m


def _largest_aligned_divisor(dim, want, align):
    """Largest d <= min(want, dim) with d % align == 0 and dim % d == 0.

    `dim` must already be a multiple of `align` (the wrapper pads to ensure
    this), so the result is always a legal, bounded tile size."""
    want = min(want, dim)
    best = align
    d = align
    while d <= want:
        if dim % d == 0:
            best = d
        d += align
    return best


def _ensemble_kernel(x_ref, w_ref, b_ref, o_ref, acc_ref):
    # x_ref: [tb, tk] bf16, w_ref: [tk, tn] bf16, b_ref: [1, tn] f32,
    # o_ref: [tb, tn] f32, acc_ref: [tb, tn] f32 (persists across the D axis).
    k = pl.program_id(2)

    @pl.when(k == 0)
    def _():
        acc_ref[...] = jnp.zeros_like(acc_ref)

    acc_ref[...] += jnp.dot(x_ref[...], w_ref[...],
                            preferred_element_type=jnp.float32)

    @pl.when(k == pl.num_programs(2) - 1)
    def _():
        o_ref[...] = (acc_ref[...] + b_ref[...]).astype(o_ref.dtype)


def fold_ensemble_params(w_stacked, b_stacked):
    """Fold the ensemble mean into one (W, b) pair. Do this ONCE at setup."""
    w_mean = jnp.mean(w_stacked.astype(jnp.float32), axis=0)   # [D, K]
    b_mean = jnp.mean(b_stacked.astype(jnp.float32), axis=0)   # [K]
    return w_mean, b_mean


def ensemble_forward(x_nchw, w_mean, b_mean, *,
                     tb_want=256, tn_want=512, tk_want=2048):
    """x_nchw: [B, C, H, W]; w_mean: [D, K] (pre-folded); b_mean: [K]."""
    B = x_nchw.shape[0]
    D, K = w_mean.shape
    out_dtype = x_nchw.dtype

    # ---- pad to hardware-friendly extents (zeros are exact for a matmul) ----
    B_pad = _round_up(B, 8)      # sublane alignment
    D_pad = _round_up(D, 128)    # lane alignment for x / sublane for W
    K_pad = _round_up(K, 128)    # lane-dense output stores

    x_flat = x_nchw.reshape(B, D)
    x_p = jnp.pad(x_flat, ((0, B_pad - B), (0, D_pad - D))).astype(jnp.bfloat16)
    w_p = jnp.pad(w_mean, ((0, D_pad - D), (0, K_pad - K))).astype(jnp.bfloat16)
    b_p = jnp.pad(b_mean, ((0, K_pad - K),)).astype(jnp.float32).reshape(1, K_pad)

    # ---- tile selection: bounded, aligned divisors of the padded dims -------
    tb_cap = tb_want
    if B_pad >= 16:
        # Give v7x's two TensorCores at least 2 parallel batch tiles.
        tb_cap = min(tb_cap, B_pad // 2)
    tb = _largest_aligned_divisor(B_pad, tb_cap, 8)
    tn = _largest_aligned_divisor(K_pad, tn_want, 128)
    tk = _largest_aligned_divisor(D_pad, tk_want, 128)

    grid = (B_pad // tb, K_pad // tn, D_pad // tk)

    # ---- cost estimate (bf16 operands, real W fetch count) ------------------
    n_b_tiles, n_k_tiles, n_d_tiles = grid
    # W is only re-fetched across B tiles when it actually changes block index
    # (i.e. when there is more than one K or D tile); otherwise Pallas keeps it
    # resident because the block index is constant between consecutive steps.
    w_fetches = n_b_tiles if (n_k_tiles > 1 or n_d_tiles > 1) else 1
    cost = pl.CostEstimate(
        flops=2 * B_pad * D_pad * K_pad,
        transcendentals=0,
        bytes_accessed=(B_pad * D_pad * 2            # x (bf16)
                        + w_fetches * D_pad * K_pad * 2  # W (bf16)
                        + K_pad * 4                  # bias (f32)
                        + B_pad * K_pad * 4),        # output (f32)
    )

    out_p = pl.pallas_call(
        _ensemble_kernel,
        out_shape=jax.ShapeDtypeStruct((B_pad, K_pad), jnp.float32),
        grid_spec=pltpu.PrefetchScalarGridSpec(
            num_scalar_prefetch=0,
            grid=grid,
            in_specs=[
                pl.BlockSpec((tb, tk), lambda i, j, k: (i, k)),
                pl.BlockSpec((tk, tn), lambda i, j, k: (k, j)),
                pl.BlockSpec((1, tn), lambda i, j, k: (0, j)),
            ],
            out_specs=pl.BlockSpec((tb, tn), lambda i, j, k: (i, j)),
            scratch_shapes=[pltpu.VMEM((tb, tn), jnp.float32)],
        ),
        compiler_params=pltpu.CompilerParams(
            dimension_semantics=("parallel", "parallel", "arbitrary"),
            vmem_limit_bytes=64 * 1024 * 1024,  # <= physical VMEM on all gens
        ),
        cost_estimate=cost,
    )(x_p, w_p, b_p)

    return out_p[:B, :K].astype(out_dtype)


def reference_forward(x_nchw, w_stacked, b_stacked):
    """Faithful ensemble semantics: per-member prediction, then mean."""
    B = x_nchw.shape[0]
    M, D, K = w_stacked.shape
    x_flat = x_nchw.reshape(B, D).astype(jnp.float32)
    preds = jnp.einsum("bd,mdk->mbk", x_flat, w_stacked.astype(jnp.float32))
    preds = preds + b_stacked.astype(jnp.float32)[:, None, :]
    return jnp.mean(preds, axis=0)


if __name__ == "__main__":
    key = jax.random.PRNGKey(0)
    B, C, H, W = 2, 4, 16, 16
    M = 3            # number of ensemble members
    K = 8            # output classes per member
    D = C * H * W

    kx, kw, kb = jax.random.split(key, 3)

    # Round test data to bf16-representable values so the check is insensitive
    # to the bf16 operand cast inside the kernel path.
    def bf16ify(a):
        return a.astype(jnp.bfloat16).astype(jnp.float32)

    x = bf16ify(jax.random.normal(kx, (B, C, H, W), dtype=jnp.float32))
    w_stacked = bf16ify(jax.random.normal(kw, (M, D, K), dtype=jnp.float32) * 0.02)
    b_stacked = bf16ify(jax.random.normal(kb, (M, K), dtype=jnp.float32) * 0.1)

    # Fold the ensemble mean ONCE (parameter setup), not per forward call.
    w_mean, b_mean = fold_ensemble_params(w_stacked, b_stacked)

    out = jax.block_until_ready(ensemble_forward(x, w_mean, b_mean))
    ref = reference_forward(x, w_stacked, b_stacked)

    assert out.shape == (B, K)
    # Tolerance covers bf16 rounding of the pre-folded mean weights (the
    # reference keeps every W_m in f32); logits are O(0.5), so real bugs show
    # up as O(0.1..1) errors.
    assert jnp.allclose(out, ref, atol=1e-2, rtol=1e-2), "mismatch vs reference"

    print("KERNEL_OK")
</pallas_src>

<mosaic_0001>
module attributes {stable_mosaic.version = 11 : i64} {
  func.func @_ensemble_kernel(%arg0: i32, %arg1: i32, %arg2: i32, %arg3: memref<8x1024xbf16, #tpu.memory_space<vmem>>, %arg4: memref<1024x128xbf16, #tpu.memory_space<vmem>>, %arg5: memref<1x128xf32, #tpu.memory_space<vmem>>, %arg6: memref<8x128xf32, #tpu.memory_space<vmem>>, %arg7: memref<8x128xf32, #tpu.memory_space<vmem>>) attributes {dimension_semantics = [#tpu.dimension_semantics<parallel>, #tpu.dimension_semantics<parallel>, #tpu.dimension_semantics<arbitrary>], iteration_bounds = array<i64: 1, 1, 1>, scalar_prefetch = 0 : i64, scratch_operands = 1 : i64, tpu.core_type = #tpu.core_type<tc>, window_params = [{transform_indices = @transform_0, window_bounds = array<i64: 8, 1024>}, {transform_indices = @transform_1, window_bounds = array<i64: 1024, 128>}, {transform_indices = @transform_2, window_bounds = array<i64: 1, 128>}, {transform_indices = @transform_3, window_bounds = array<i64: 8, 128>}]} {
    %c0_i32 = arith.constant 0 : i32
    %0 = arith.cmpi eq, %arg2, %c0_i32 : i32
    %1 = arith.extui %0 : i1 to i32
    %c0_i32_0 = arith.constant 0 : i32
    %2 = arith.cmpi ne, %1, %c0_i32_0 : i32
    scf.if %2 {
      %cst_10 = arith.constant 0.000000e+00 : f32
      %12 = vector.broadcast %cst_10 : f32 to vector<8x128xf32>
      %c0_11 = arith.constant 0 : index
      %c0_12 = arith.constant 0 : index
      %13 = vector.load %arg7[%c0_11, %c0_12] : memref<8x128xf32, #tpu.memory_space<vmem>>, vector<8x128xf32>
      tpu.vector_store %arg7[%c0_11, %c0_12], %12 {strides = array<i32>} : memref<8x128xf32, #tpu.memory_space<vmem>>, vector<8x128xf32>,
    } else {
    }
    %c0 = arith.constant 0 : index
    %c0_1 = arith.constant 0 : index
    %3 = vector.load %arg7[%c0, %c0_1] : memref<8x128xf32, #tpu.memory_space<vmem>>, vector<8x128xf32>
    %c0_2 = arith.constant 0 : index
    %c0_3 = arith.constant 0 : index
    %4 = vector.load %arg3[%c0_2, %c0_3] : memref<8x1024xbf16, #tpu.memory_space<vmem>>, vector<8x1024xbf16>
    %c0_4 = arith.constant 0 : index
    %c0_5 = arith.constant 0 : index
    %5 = vector.load %arg4[%c0_4, %c0_5] : memref<1024x128xbf16, #tpu.memory_space<vmem>>, vector<1024x128xbf16>
    %cst = arith.constant dense<0.000000e+00> : vector<8x128xf32>
    %6 = tpu.matmul %4, %5, %cst {dimension_numbers = #tpu.dot_dimension_numbers<[1], [0], [0], [1], [0, 0, 1, 1], [], []>} : vector<8x1024xbf16>, vector<1024x128xbf16>, vector<8x128xf32> -> vector<8x128xf32>
    %7 = arith.addf %3, %6 : vector<8x128xf32>
    %c0_6 = arith.constant 0 : index
    %c0_7 = arith.constant 0 : index
    %8 = vector.load %arg7[%c0_6, %c0_7] : memref<8x128xf32, #tpu.memory_space<vmem>>, vector<8x128xf32>
    tpu.vector_store %arg7[%c0_6, %c0_7], %7 {strides = array<i32>} : memref<8x128xf32, #tpu.memory_space<vmem>>, vector<8x128xf32>,
    %c0_i32_8 = arith.constant 0 : i32
    %9 = arith.cmpi eq, %arg2, %c0_i32_8 : i32
    %10 = arith.extui %9 : i1 to i32
    %c0_i32_9 = arith.constant 0 : i32
    %11 = arith.cmpi ne, %10, %c0_i32_9 : i32
    scf.if %11 {
      %c0_10 = arith.constant 0 : index
      %c0_11 = arith.constant 0 : index
      %12 = vector.load %arg7[%c0_10, %c0_11] : memref<8x128xf32, #tpu.memory_space<vmem>>, vector<8x128xf32>
      %c0_12 = arith.constant 0 : index
      %c0_13 = arith.constant 0 : index
      %13 = vector.load %arg5[%c0_12, %c0_13] : memref<1x128xf32, #tpu.memory_space<vmem>>, vector<1x128xf32>
      %14 = vector.broadcast %13 : vector<1x128xf32> to vector<8x128xf32>
      %15 = arith.addf %12, %14 : vector<8x128xf32>
      %c0_14 = arith.constant 0 : index
      %c0_15 = arith.constant 0 : index
      %16 = vector.load %arg6[%c0_14, %c0_15] : memref<8x128xf32, #tpu.memory_space<vmem>>, vector<8x128xf32>
      tpu.vector_store %arg6[%c0_14, %c0_15], %15 {strides = array<i32>} : memref<8x128xf32, #tpu.memory_space<vmem>>, vector<8x128xf32>,
    } else {
    }
    return
  }
  func.func @transform_0(%arg0: i32, %arg1: i32, %arg2: i32) -> (i32, i32) {
    %c0_i32 = arith.constant 0 : i32
    return %arg0, %arg2 : i32, i32
  }
  func.func @transform_1(%arg0: i32, %arg1: i32, %arg2: i32) -> (i32, i32) {
    %c0_i32 = arith.constant 0 : i32
    return %arg2, %arg1 : i32, i32
  }
  func.func @transform_2(%arg0: i32, %arg1: i32, %arg2: i32) -> (i32, i32) {
    %c0_i32 = arith.constant 0 : i32
    %c0_i32_0 = arith.constant 0 : i32
    return %c0_i32, %arg1 : i32, i32
  }
  func.func @transform_3(%arg0: i32, %arg1: i32, %arg2: i32) -> (i32, i32) {
    %c0_i32 = arith.constant 0 : i32
    return %arg0, %arg1 : i32, i32
  }
}

</mosaic_0001>

<bundles_post_ra>
// kernel: tpu_custom_call.1
= control target key start
LH: loop header
LB: loop body
LE: loop exit
PB: predicated region body
PF: predicated region fallthrough
CT: control target
= control target key end

     0   :  { %8 = vsyncpa [#allocation4], 0  ;;  %s1201_s0 = inlined_call_operand.hbm [shape: bf16[8,1024], index: 0, kind: input, shape index: {}]   ;;  %s1202_s1 = inlined_call_operand.hbm [shape: bf16[1024,128], index: 1, kind: input, shape index: {}]   ;;  %s1203_s2 = inlined_call_operand.hbm [shape: f32[1,128], index: 2, kind: input, shape index: {}]   ;;  %s1204_s3 = inlined_call_operand.hbm [shape: f32[8,128], index: 3, kind: output, shape index: {}]  }
   0x1   :  { %9 = vsyncpa [#allocation7], 0 }
   0x2   :  { %10 = vsyncpa [#allocation5], 0  ;;  %s1127_s12 = smov [#allocation6]   ;;  %s1033_s16 = scalar_lea.hbm %s1202_s1, 8192 }
   0x3   :  { %s26_s13 = sshll.u32 %s1127_s12, 4  ;;  %p1034_p0 = scmp.ne.s32.totalorder %s1202_s1, %s1033_s16  ;;  %s27_s13 = int_to_ptr.vmem [resolvable:$true] %s26_s13 }
   0x4   :  { %p1037_p1 = scmp.lt.u32.totalorder %s1033_s16, %s1202_s1 }
   0x6   :  { %p1039_p2 = pnand %p1037_p1, %p1034_p0 }
   0x8   :  { %1042 = shalt.err (!%p1039_p2)
}
   0x9   :  { %s1043_s21 = scalar_lea.vmem %s27_s13, 8192  ;;  %p1048_p4 = scmp.lt.s32.totalorder %s27_s13, %s27_s13 }
   0xa   :  { %p1044_p3 = scmp.ne.s32.totalorder %s27_s13, %s1043_s21  ;;  %p1049_p5 = scmp.lt.s32.totalorder %s1043_s21, %s1043_s21 }
   0xc   :  { %p1050_p6 = por %p1049_p5, %p1048_p4 }
   0xe   :  { %p1051_p7 = pnand %p1050_p6, %p1044_p3 }
  0x10   :  { %1054 = shalt.err (!%p1051_p7)
}
  0x11   :  { %s1128_s22 = smov 64   ;;  %s1129_s23 = smov 4  }
  0x12   :  { %32 = dma.hbm_to_vmem [thread:$0]  %s1202_s1, 8192, %s27_s13, [#allocation7], %s1128_s22, %s1128_s22, %s1129_s23  }
  0x13   :  { %s1130_s26 = smov [#allocation3]   ;;  %s1131_s28 = smov [#allocation8]  }
  0x14   :  { %s17_s27 = sshll.u32 %s1130_s26, 4  ;;  %s39_s29 = sshll.u32 %s1131_s28, 4  ;;  %s18_s27 = int_to_ptr.vmem [resolvable:$true] %s17_s27  ;;  %s40_s29 = int_to_ptr.vmem [resolvable:$true] %s39_s29 }
  0x15   :  { %s1055_s5 = scalar_lea.hbm %s1201_s0, 512 }
  0x16   :  { %p1056_p8 = scmp.ne.s32.totalorder %s1201_s0, %s1055_s5  ;;  %p1059_p9 = scmp.lt.u32.totalorder %s1055_s5, %s1201_s0 }
  0x18   :  { %p1061_p10 = pnand %p1059_p9, %p1056_p8 }
  0x1a   :  { %1064 = shalt.err (!%p1061_p10)
}
  0x1b   :  { %s1065_s1 = scalar_lea.vmem %s18_s27, 512  ;;  %p1070_p12 = scmp.lt.s32.totalorder %s18_s27, %s18_s27 }
  0x1c   :  { %p1066_p11 = scmp.ne.s32.totalorder %s18_s27, %s1065_s1  ;;  %p1071_p13 = scmp.lt.s32.totalorder %s1065_s1, %s1065_s1 }
  0x1e   :  { %p1072_p0 = por %p1071_p13, %p1070_p12 }
  0x20   :  { %p1073_p1 = pnand %p1072_p0, %p1066_p11 }
  0x22   :  { %1076 = shalt.err (!%p1073_p1)
}
  0x23   :  { %20 = dma.hbm_to_vmem [thread:$0]  %s1201_s0, 512, %s18_s27, [#allocation4]  }
  0x24   :  { %s1077_s14 = scalar_lea.hbm %s1203_s2, 16 }
  0x25   :  { %p1078_p2 = scmp.ne.s32.totalorder %s1203_s2, %s1077_s14  ;;  %p1081_p3 = scmp.lt.u32.totalorder %s1077_s14, %s1203_s2 }
  0x27   :  { %p1083_p4 = pnand %p1081_p3, %p1078_p2 }
  0x29   :  { %1086 = shalt.err (!%p1083_p4)
}
  0x2a   :  { %s1087_s19 = scalar_lea.vmem %s40_s29, 16  ;;  %s1091_s20 = scalar_lea.vmem %s40_s29, 32 }
  0x2b   :  { %p1088_p5 = scmp.ne.s32.totalorder %s40_s29, %s1087_s19  ;;  %p1092_p6 = scmp.lt.s32.totalorder %s40_s29, %s40_s29 }
  0x2c   :  { %p1093_p7 = scmp.lt.s32.totalorder %s1091_s20, %s1087_s19 }
  0x2e   :  { %p1094_p8 = por %p1093_p7, %p1092_p6 }
  0x30   :  { %p1095_p9 = pnand %p1094_p8, %p1088_p5 }
  0x32   :  { %1098 = shalt.err (!%p1095_p9)
}
  0x33   :  { %42 = dma.hbm_to_vmem [thread:$0]  %s1203_s2, 16, %s40_s29, [#allocation7]  }
  0x34   :  { %1121 = dma.done.wait [#allocation4], 512  }
  0x35   :  { %1122 = vsyncadd [#allocation4], 4294966784 }
  0x36   :  { %1123 = dma.done.wait [#allocation7], 8208  }
  0x37   :  { %1124 = vsyncadd [#allocation7], 4294959088  ;;  %v961_v0 = vld [vmem:[#allocation6 + $0x40] sm:$0xff]   ;;  %v965_v4 = vld [vmem:[#allocation6 + $0x48] sm:$0xff]   ;;  %s1132_s2 = smov [#allocation9]  }
  0x38   :  { %v962_v1 = vld [vmem:[#allocation6 + $0xc0] sm:$0xff]   ;;  %867 = vmatprep.subr.bf16.mxu0 %v961_v0  ;;  %v966_v5 = vld [vmem:[#allocation6 + $0xc8] sm:$0xff]   ;;  %v969_v8 = vld [vmem:[#allocation6 + $0x50] sm:$0xff]   ;;  %s784_s22 = sshll.u32 %s1132_s2, 4  ;;  %s785_s22 = int_to_ptr.vmem [resolvable:$true] %s784_s22 }
  0x39   :  { %v963_v2 = vld [vmem:[#allocation6] sm:$0xff]   ;;  %889 = vmatprep.subr.bf16.mxu1 %v962_v1  ;;  %v967_v6 = vld [vmem:[#allocation6 + $0x8] sm:$0xff]   ;;  %v970_v9 = vld [vmem:[#allocation6 + $0xd0] sm:$0xff]   ;;  %s1099_s23 = scalar_lea.vmem %s785_s22, 128  ;;  %p1104_p11 = scmp.lt.s32.totalorder %s785_s22, %s785_s22 }
  0x3a   :  { %v964_v3 = vld [vmem:[#allocation6 + $0x80] sm:$0xff]   ;;  %868 = vmatpush3.bf16.msra.mxu0 %v963_v2  ;;  %v968_v7 = vld [vmem:[#allocation6 + $0x88] sm:$0xff]   ;;  %v971_v10 = vld [vmem:[#allocation6 + $0x10] sm:$0xff]   ;;  %p1100_p10 = scmp.ne.s32.totalorder %s785_s22, %s1099_s23  ;;  %p1105_p12 = scmp.lt.s32.totalorder %s1099_s23, %s1099_s23 }
  0x3b   :  { %890 = vmatpush3.bf16.msra.mxu1 %v964_v3  ;;  %869 = vmatprep.subr.bf16.mxu0 %v965_v4  ;;  %v972_v11 = vld [vmem:[#allocation6 + $0x90] sm:$0xff]   ;;  %v973_v12 = vld [vmem:[#allocation6 + $0x58] sm:$0xff]   ;;  %v977_v16 = vld [vmem:[#allocation6 + $0x60] sm:$0xff]  }
  0x3c   :  { %891 = vmatprep.subr.bf16.mxu1 %v966_v5  ;;  %v974_v13 = vld [vmem:[#allocation6 + $0xd8] sm:$0xff]   ;;  %v978_v17 = vld [vmem:[#allocation6 + $0xe0] sm:$0xff]   ;;  %v981_v20 = vld [vmem:[#allocation6 + $0x68] sm:$0xff]   ;;  %p1106_p13 = por %p1105_p12, %p1104_p11 }
  0x3d   :  { %v975_v14 = vld [vmem:[#allocation6 + $0x18] sm:$0xff]   ;;  %v979_v18 = vld [vmem:[#allocation6 + $0x20] sm:$0xff]   ;;  %v982_v21 = vld [vmem:[#allocation6 + $0xe8] sm:$0xff]  }
  0x3e   :  { %870 = vmatpush3.bf16.msra.mxu0 %v967_v6  ;;  %v976_v15 = vld [vmem:[#allocation6 + $0x98] sm:$0xff]   ;;  %v980_v19 = vld [vmem:[#allocation6 + $0xa0] sm:$0xff]   ;;  %v983_v22 = vld [vmem:[#allocation6 + $0x28] sm:$0xff]   ;;  %p1107_p0 = pnand %p1106_p13, %p1100_p10 }
  0x3f   :  { %892 = vmatpush3.bf16.msra.mxu1 %v968_v7  ;;  %871 = vmatprep.subr.bf16.mxu0 %v969_v8  ;;  %v984_v23 = vld [vmem:[#allocation6 + $0xa8] sm:$0xff]   ;;  %v985_v24 = vld [vmem:[#allocation6 + $0x70] sm:$0xff]   ;;  %v989_v28 = vld [vmem:[#allocation6 + $0x78] sm:$0xff]  }
  0x40   :  { %893 = vmatprep.subr.bf16.mxu1 %v970_v9  ;;  %v986_v25 = vld [vmem:[#allocation6 + $0xf0] sm:$0xff]   ;;  %v990_v29 = vld [vmem:[#allocation6 + $0xf8] sm:$0xff]   ;;  %v59_v32 = vld [vmem:[#allocation3] sm:$0xff] }
  0x41   :  { %v987_v26 = vld [vmem:[#allocation6 + $0x30] sm:$0xff]   ;;  %v991_v30 = vld [vmem:[#allocation6 + $0x38] sm:$0xff]   ;;  %v60_v33 = vld [vmem:[#allocation3 + $0x8] sm:$0xff]  ;;  %v794_v34 = vcombine.low %v59_v32, %v59_v32  ;;  %v795_v35 = vcombine.high %v59_v32, %v59_v32 }
  0x42   :  { %872 = vmatpush3.bf16.msra.mxu0 %v971_v10  ;;  %v988_v27 = vld [vmem:[#allocation6 + $0xb0] sm:$0xff]   ;;  %v992_v31 = vld [vmem:[#allocation6 + $0xb8] sm:$0xff]   ;;  %v796_v36 = vcombine.low %v60_v33, %v60_v33  ;;  %v797_v37 = vcombine.high %v60_v33, %v60_v33  ;;  %v997_v38 = vld [vmem:[#allocation6 + $0x140] sm:$0xff]  }
  0x43   :  { %894 = vmatpush3.bf16.msra.mxu1 %v972_v11  ;;  %873 = vmatprep.subr.bf16.mxu0 %v973_v12  ;;  %v998_v39 = vld [vmem:[#allocation6 + $0x1c0] sm:$0xff]   ;;  %v1001_v42 = vld [vmem:[#allocation6 + $0x148] sm:$0xff]   ;;  %v1005_v46 = vld [vmem:[#allocation6 + $0x150] sm:$0xff]  }
  0x44   :  { %895 = vmatprep.subr.bf16.mxu1 %v974_v13  ;;  %635 = vmatprep.mubr.bf16.mxu0 %v795_v35  ;;  %v999_v40 = vld [vmem:[#allocation6 + $0x100] sm:$0xff]   ;;  %v1002_v43 = vld [vmem:[#allocation6 + $0x1c8] sm:$0xff]   ;;  %v1006_v47 = vld [vmem:[#allocation6 + $0x1d0] sm:$0xff]  }
  0x45   :  { %675 = vmatprep.mubr.bf16.mxu1 %v797_v37  ;;  %v1000_v41 = vld [vmem:[#allocation6 + $0x180] sm:$0xff]   ;;  %v1003_v44 = vld [vmem:[#allocation6 + $0x108] sm:$0xff]   ;;  %v1007_v48 = vld [vmem:[#allocation6 + $0x110] sm:$0xff]  }
  0x46   :  { %874 = vmatpush3.bf16.msra.mxu0 %v975_v14  ;;  %v1004_v45 = vld [vmem:[#allocation6 + $0x188] sm:$0xff]   ;;  %v1008_v49 = vld [vmem:[#allocation6 + $0x190] sm:$0xff]   ;;  %v1009_v50 = vld [vmem:[#allocation6 + $0x158] sm:$0xff]  }
  0x47   :  { %896 = vmatpush3.bf16.msra.mxu1 %v976_v15  ;;  %875 = vmatprep.subr.bf16.mxu0 %v977_v16  ;;  %v1010_v51 = vld [vmem:[#allocation6 + $0x1d8] sm:$0xff]   ;;  %v1013_v54 = vld [vmem:[#allocation6 + $0x160] sm:$0xff]   ;;  %v1017_v58 = vld [vmem:[#allocation6 + $0x168] sm:$0xff]  }
  0x48   :  { %897 = vmatprep.subr.bf16.mxu1 %v978_v17  ;;  %v1011_v52 = vld [vmem:[#allocation6 + $0x118] sm:$0xff]   ;;  %v1014_v55 = vld [vmem:[#allocation6 + $0x1e0] sm:$0xff]   ;;  %v1018_v59 = vld [vmem:[#allocation6 + $0x1e8] sm:$0xff]  }
  0x49   :  { %v1012_v53 = vld [vmem:[#allocation6 + $0x198] sm:$0xff]   ;;  %v1015_v56 = vld [vmem:[#allocation6 + $0x120] sm:$0xff]   ;;  %v1019_v60 = vld [vmem:[#allocation6 + $0x128] sm:$0xff]  }
  0x4a   :  { %876 = vmatpush3.bf16.msra.mxu0 %v979_v18  ;;  %v1016_v57 = vld [vmem:[#allocation6 + $0x1a0] sm:$0xff]   ;;  %v1020_v61 = vld [vmem:[#allocation6 + $0x1a8] sm:$0xff]   ;;  %v1021_v62 = vld [vmem:[#allocation6 + $0x170] sm:$0xff]  }
  0x4b   :  { %898 = vmatpush3.bf16.msra.mxu1 %v980_v19  ;;  %877 = vmatprep.subr.bf16.mxu0 %v981_v20  ;;  %v1022_v63 = vld [vmem:[#allocation6 + $0x1f0] sm:$0xff]   ;;  %v1025_v2 = vld [vmem:[#allocation6 + $0x178] sm:$0xff]  }
  0x4c   :  { %899 = vmatprep.subr.bf16.mxu1 %v982_v21  ;;  %v1023_v0 = vld [vmem:[#allocation6 + $0x130] sm:$0xff]   ;;  %v1026_v3 = vld [vmem:[#allocation6 + $0x1f8] sm:$0xff]  }
  0x4d   :  { %v1024_v1 = vld [vmem:[#allocation6 + $0x1b0] sm:$0xff]   ;;  %v1027_v4 = vld [vmem:[#allocation6 + $0x138] sm:$0xff]  }
  0x4e   :  { %878 = vmatpush3.bf16.msra.mxu0 %v983_v22  ;;  %v1028_v5 = vld [vmem:[#allocation6 + $0x1b8] sm:$0xff]   ;;  %v61_v6 = vld [vmem:[#allocation3 + $0x10] sm:$0xff] }
  0x4f   :  { %900 = vmatpush3.bf16.msra.mxu1 %v984_v23  ;;  %879 = vmatprep.subr.bf16.mxu0 %v985_v24  ;;  %v798_v7 = vcombine.low %v61_v6, %v61_v6  ;;  %v799_v8 = vcombine.high %v61_v6, %v61_v6  ;;  %v62_v9 = vld [vmem:[#allocation3 + $0x18] sm:$0xff] }
  0x50   :  { %901 = vmatprep.subr.bf16.mxu1 %v986_v25  ;;  %v800_v10 = vcombine.low %v62_v9, %v62_v9  ;;  %v801_v11 = vcombine.high %v62_v9, %v62_v9 }
  0x52   :  { %880 = vmatpush3.bf16.msra.mxu0 %v987_v26 }
  0x53   :  { %902 = vmatpush3.bf16.msra.mxu1 %v988_v27  ;;  %881 = vmatprep.subr.bf16.mxu0 %v989_v28 }
  0x54   :  { %903 = vmatprep.subr.bf16.mxu1 %v990_v29 }
  0x56   :  { %882 = vmatpush3.bf16.msra.mxu0 %v991_v30 }
  0x57   :  { %904 = vmatpush3.bf16.msra.mxu1 %v992_v31  ;;  %911 = vmatprep.subr.bf16.mxu0 %v997_v38 }
  0x58   :  { %933 = vmatprep.subr.bf16.mxu1 %v998_v39 }
  0x59   :  { %636 = vmatmul.mubr.bf16.vlgmr.msra.gmra.mrb[0].mxu0 %v794_v34  ;;  %v866_v34 = vld [vmem:[#allocation8] ss:$0 sm:$0xff] }
  0x5a   :  { %676 = vmatmul.mubr.bf16.vlgmr.msra.gmra.mrb[0].mxu1 %v796_v36  ;;  %912 = vmatpush3.bf16.msra.mxu0 %v999_v40 }
  0x5b   :  { %934 = vmatpush3.bf16.msra.mxu1 %v1000_v41  ;;  %913 = vmatprep.subr.bf16.mxu0 %v1001_v42 }
  0x5c   :  { %935 = vmatprep.subr.bf16.mxu1 %v1002_v43  ;;  %715 = vmatprep.mubr.bf16.mxu0 %v799_v8 }
  0x5d   :  { %755 = vmatprep.mubr.bf16.mxu1 %v801_v11 }
  0x5e   :  { %914 = vmatpush3.bf16.msra.mxu0 %v1003_v44 }
  0x5f   :  { %936 = vmatpush3.bf16.msra.mxu1 %v1004_v45  ;;  %915 = vmatprep.subr.bf16.mxu0 %v1005_v46 }
  0x60   :  { %937 = vmatprep.subr.bf16.mxu1 %v1006_v47 }
  0x62   :  { %916 = vmatpush3.bf16.msra.mxu0 %v1007_v48 }
  0x63   :  { %938 = vmatpush3.bf16.msra.mxu1 %v1008_v49  ;;  %917 = vmatprep.subr.bf16.mxu0 %v1009_v50 }
  0x64   :  { %939 = vmatprep.subr.bf16.mxu1 %v1010_v51 }
  0x66   :  { %918 = vmatpush3.bf16.msra.mxu0 %v1011_v52 }
  0x67   :  { %940 = vmatpush3.bf16.msra.mxu1 %v1012_v53  ;;  %919 = vmatprep.subr.bf16.mxu0 %v1013_v54 }
  0x68   :  { %941 = vmatprep.subr.bf16.mxu1 %v1014_v55 }
  0x6a   :  { %920 = vmatpush3.bf16.msra.mxu0 %v1015_v56 }
  0x6b   :  { %942 = vmatpush3.bf16.msra.mxu1 %v1016_v57  ;;  %921 = vmatprep.subr.bf16.mxu0 %v1017_v58 }
  0x6c   :  { %943 = vmatprep.subr.bf16.mxu1 %v1018_v59 }
  0x6e   :  { %922 = vmatpush3.bf16.msra.mxu0 %v1019_v60 }
  0x6f   :  { %944 = vmatpush3.bf16.msra.mxu1 %v1020_v61  ;;  %923 = vmatprep.subr.bf16.mxu0 %v1021_v62 }
  0x70   :  { %945 = vmatprep.subr.bf16.mxu1 %v1022_v63 }
  0x72   :  { %924 = vmatpush3.bf16.msra.mxu0 %v1023_v0 }
  0x73   :  { %946 = vmatpush3.bf16.msra.mxu1 %v1024_v1  ;;  %925 = vmatprep.subr.bf16.mxu0 %v1025_v2 }
  0x74   :  { %947 = vmatprep.subr.bf16.mxu1 %v1026_v3 }
  0x76   :  { %926 = vmatpush3.bf16.msra.mxu0 %v1027_v4 }
  0x77   :  { %948 = vmatpush3.bf16.msra.mxu1 %v1028_v5 }
  0x79   :  { %716 = vmatmul.mubr.bf16.vlgmr.msra.gmra.mrb[4].mxu0 %v798_v7 }
  0x7a   :  { %756 = vmatmul.mubr.bf16.vlgmr.msra.gmra.mrb[4].mxu1 %v800_v10 }
 0x12c   :  { %v883_v12 = vpop.f32.mrb[0].mxu0 }
 0x12d   :  { %v905_v13 = vpop.f32.mrb[0].mxu1  ;;  %v884_v14 = vpop.f32.mrb[1].mxu0 }
 0x12e   :  { %v906_v15 = vpop.f32.mrb[1].mxu1  ;;  %v885_v16 = vadd.f32 %v884_v14, %v883_v12  ;;  %v886_v18 = vpop.f32.mrb[2].mxu0 }
 0x12f   :  { %v907_v17 = vadd.f32 %v906_v15, %v905_v13  ;;  %v908_v19 = vpop.f32.mrb[2].mxu1  ;;  %v887_v20 = vpop.f32.mrb[3].mxu0 }
 0x130   :  { %v909_v21 = vpop.f32.mrb[3].mxu1 }
 0x131   :  { %v678_v22 = vadd.f32 %v907_v17, %v885_v16 }
 0x14c   :  { %v927_v23 = vpop.f32.mrb[4].mxu0 }
 0x14d   :  { %v949_v24 = vpop.f32.mrb[4].mxu1  ;;  %v928_v25 = vpop.f32.mrb[5].mxu0 }
 0x14e   :  { %v950_v26 = vpop.f32.mrb[5].mxu1  ;;  %v929_v27 = vadd.f32 %v928_v25, %v927_v23  ;;  %v930_v29 = vpop.f32.mrb[6].mxu0 }
 0x14f   :  { %v951_v28 = vadd.f32 %v950_v26, %v949_v24  ;;  %v952_v30 = vpop.f32.mrb[6].mxu1  ;;  %v931_v31 = vpop.f32.mrb[7].mxu0 }
 0x150   :  { %v953_v32 = vpop.f32.mrb[7].mxu1  ;;  %v718_v33 = vadd.f32 %v929_v27, %v678_v22 }
 0x152   :  { %v758_v35 = vadd.f32 %v951_v28, %v718_v33 }
 0x154   :  { %v776_v36 = vadd.f32 %v866_v34, %v758_v35 }
 0x156   :  { %777 = vst [vmem:[#allocation9] sm:$0xff] %v776_v36 }
 0x157   :  { %1110 = shalt.err (!%p1107_p0)
}
 0x158   :  { %s1111_s26 = scalar_lea.hbm %s1204_s3, 128 }
 0x159   :  { %p1112_p1 = scmp.ne.s32.totalorder %s1204_s3, %s1111_s26  ;;  %p1115_p2 = scmp.lt.u32.totalorder %s1111_s26, %s1204_s3 }
 0x15b   :  { %p1117_p3 = pnand %p1115_p2, %p1112_p1 }
 0x15d   :  { %1120 = shalt.err (!%p1117_p3)
}
 0x15e   :  { %787 = dma.vmem_to_hbm [thread:$0]  %s785_s22, 128, %s1204_s3, [#allocation5]  }
 0x15f   :  { %1125 = dma.done.wait [#allocation5], 128  }
 0x160   :  { %1126 = vsyncadd [#allocation5], 4294967168 }
 0x161   :  { %791 = vsyncpa [#allocation4], 1 }
 0x162   :  { %792 = vsyncpa [#allocation7], 1 }
 0x163   :  { %793 = vsyncpa [#allocation5], 1 }

</bundles_post_ra>
